<compile_context>
chip_gen: v5e
topology: v5e:2x2
jax: 0.10.0
libtpu: 0.0.40
codegen_flags: <defaults>
</compile_context>

<pallas_src>
import jax
import jax.numpy as jnp
from jax.experimental import pallas as pl
from jax.experimental.pallas import tpu as pltpu

# Problem sizes (small shapes consistent with the module: 3 in / 2 out / 3x3 kernel)
N = 1
C_IN = 3
C_OUT = 2
KH = KW = 3
H = W = 16
OH = H - KH + 1  # 14
OW = W - KW + 1  # 14
LANES = 128      # lane-padded width


def conv_elt_kernel(x_ref, w_ref, b_ref, o_ref):
    # x_ref : (C_IN, H, LANES)        VMEM f32  (W lane-padded to 128)
    # w_ref : (C_OUT*C_IN*KH*KW,)     SMEM f32  (OIHW weights, pre-scaled by 4.1)
    # b_ref : (C_OUT,)                SMEM f32  (bias with epilogue affine folded in)
    # o_ref : (C_OUT, H, LANES)       VMEM f32  (full tiles; cropped to OHxOW outside)

    # Independent partial accumulators per (oc, input channel) -> ILP on the VPU.
    acc = [[None] * C_IN for _ in range(C_OUT)]

    for c in range(C_IN):
        x_c = x_ref[c]  # (H, LANES) single full-tile load, reused for all 9*2 terms
        for kw in range(KW):
            # Lane shift by kw via one XLU rotate (wrap lanes >= OW are garbage,
            # cropped in the wrapper).  NOTE: pltpu.roll needs a non-negative axis.
            x_kw = x_c if kw == 0 else pltpu.roll(x_c, shift=LANES - kw, axis=1)
            for kh in range(KH):
                # Sublane shift by kh via one XLU rotate; rows >= OH are garbage
                # and are cropped in the wrapper.  Keeps every multiply-add on
                # whole, aligned (16, 128) tiles (no sublane-unaligned slices).
                win = x_kw if kh == 0 else pltpu.roll(x_kw, shift=H - kh, axis=0)
                # Reuse this shifted window for both output channels.
                for oc in range(C_OUT):
                    widx = ((oc * C_IN + c) * KH + kh) * KW + kw
                    term = w_ref[widx] * win
                    if acc[oc][c] is None:
                        if c == 0:
                            # Fold the (already epilogue-fused) bias into the
                            # very first term of this output channel.
                            term = term + b_ref[oc]
                        acc[oc][c] = term
                    else:
                        acc[oc][c] = acc[oc][c] + term

    for oc in range(C_OUT):
        # Tree-sum the per-channel partials; epilogue/bias already folded in.
        y = (acc[oc][0] + acc[oc][1]) + acc[oc][2]
        o_ref[oc, :, :] = y.astype(o_ref.dtype)


@jax.jit
def model_forward(x_nchw, w_oihw, b):
    """x_nchw: (1, C_IN, H, W) f32 -> (1, C_OUT, OH, OW) f32"""
    x_chw = x_nchw[0]  # squeeze N=1

    # Lane-pad the width to 128 so the kernel only does full-tile loads/stores.
    x_pad = jnp.pad(x_chw, ((0, 0), (0, 0), (0, LANES - W)))

    # Fold the elementwise epilogue ((v - 72.65) * 4.1 + 4.17) into the conv
    # parameters:  y = 4.1*conv(x, w) + (4.1*b - 72.65*4.1 + 4.17)
    scale = jnp.float32(4.1)
    w_flat = (w_oihw * scale).reshape(-1).astype(jnp.float32)
    b_fused = (b * scale + jnp.float32(-72.65 * 4.1 + 4.17)).astype(jnp.float32)

    out = pl.pallas_call(
        conv_elt_kernel,
        out_shape=jax.ShapeDtypeStruct((C_OUT, H, LANES), jnp.float32),
        in_specs=[
            pl.BlockSpec(memory_space=pltpu.MemorySpace.VMEM),   # x (padded)
            pl.BlockSpec(memory_space=pltpu.MemorySpace.SMEM),   # fused weights
            pl.BlockSpec(memory_space=pltpu.MemorySpace.SMEM),   # fused bias
        ],
        out_specs=pl.BlockSpec(memory_space=pltpu.MemorySpace.VMEM),
    )(x_pad, w_flat, b_fused)

    # Crop the sublane/lane padding (garbage from roll wraparound) and restore N.
    return out[None, :, :OH, :OW]


def reference_forward(x_nchw, w_oihw, b):
    """Pure-JAX reference (lax conv) for sanity checking."""
    v1 = jax.lax.conv_general_dilated(
        x_nchw, w_oihw,
        window_strides=(1, 1), padding="VALID",
        dimension_numbers=("NCHW", "OIHW", "NCHW"),
    ) + b.reshape(1, C_OUT, 1, 1)
    return (v1 - 72.65) * 4.1 + 4.17


if __name__ == "__main__":
    key = jax.random.PRNGKey(0)
    kx, kw, kb = jax.random.split(key, 3)

    # Deterministic synthetic parameters (Conv2d(3, 2, 3) shapes).
    fan_in = C_IN * KH * KW
    bound = 1.0 / (fan_in ** 0.5)
    weight = jax.random.uniform(kw, (C_OUT, C_IN, KH, KW), jnp.float32,
                                minval=-bound, maxval=bound)
    bias = jax.random.uniform(kb, (C_OUT,), jnp.float32,
                              minval=-bound, maxval=bound)

    x = jax.random.normal(kx, (N, C_IN, H, W), jnp.float32)

    y = model_forward(x, weight, bias)
    y = jax.block_until_ready(y)

    y_ref = reference_forward(x, weight, bias)
    assert y.shape == (N, C_OUT, OH, OW)
    assert jnp.allclose(y, y_ref, atol=1e-3, rtol=1e-3)

    print("KERNEL_OK")
</pallas_src>

<mosaic_0001>
module attributes {stable_mosaic.version = 11 : i64} {
  func.func @conv_elt_kernel(%arg0: memref<3x16x128xf32, #tpu.memory_space<vmem>>, %arg1: memref<54xf32, #tpu.memory_space<smem>>, %arg2: memref<2xf32, #tpu.memory_space<smem>>, %arg3: memref<2x16x128xf32, #tpu.memory_space<vmem>>) attributes {dimension_semantics = [], scalar_prefetch = 0 : i64, scratch_operands = 0 : i64, tpu.core_type = #tpu.core_type<tc>} {
    %c0 = arith.constant 0 : index
    %c0_0 = arith.constant 0 : index
    %c0_1 = arith.constant 0 : index
    %0 = vector.load %arg0[%c0, %c0_0, %c0_1] : memref<3x16x128xf32, #tpu.memory_space<vmem>>, vector<1x16x128xf32>
    %1 = vector.shape_cast %0 : vector<1x16x128xf32> to vector<16x128xf32>
    %c0_2 = arith.constant 0 : index
    %2 = memref.load %arg1[%c0_2] : memref<54xf32, #tpu.memory_space<smem>>
    %3 = vector.broadcast %2 : f32 to vector<16x128xf32>
    %4 = arith.mulf %3, %1 : vector<16x128xf32>
    %c0_3 = arith.constant 0 : index
    %5 = memref.load %arg2[%c0_3] : memref<2xf32, #tpu.memory_space<smem>>
    %6 = vector.broadcast %5 : f32 to vector<16x128xf32>
    %7 = arith.addf %4, %6 : vector<16x128xf32>
    %c27 = arith.constant 27 : index
    %8 = memref.load %arg1[%c27] : memref<54xf32, #tpu.memory_space<smem>>
    %9 = vector.broadcast %8 : f32 to vector<16x128xf32>
    %10 = arith.mulf %9, %1 : vector<16x128xf32>
    %c1 = arith.constant 1 : index
    %11 = memref.load %arg2[%c1] : memref<2xf32, #tpu.memory_space<smem>>
    %12 = vector.broadcast %11 : f32 to vector<16x128xf32>
    %13 = arith.addf %10, %12 : vector<16x128xf32>
    %c15_i32 = arith.constant 15 : i32
    %14 = tpu.dynamic_rotate %1 by %c15_i32 dim 0 : vector<16x128xf32>, i32 -> vector<16x128xf32>
    %c3 = arith.constant 3 : index
    %15 = memref.load %arg1[%c3] : memref<54xf32, #tpu.memory_space<smem>>
    %16 = vector.broadcast %15 : f32 to vector<16x128xf32>
    %17 = arith.mulf %16, %14 : vector<16x128xf32>
    %18 = arith.addf %7, %17 : vector<16x128xf32>
    %c30 = arith.constant 30 : index
    %19 = memref.load %arg1[%c30] : memref<54xf32, #tpu.memory_space<smem>>
    %20 = vector.broadcast %19 : f32 to vector<16x128xf32>
    %21 = arith.mulf %20, %14 : vector<16x128xf32>
    %22 = arith.addf %13, %21 : vector<16x128xf32>
    %c14_i32 = arith.constant 14 : i32
    %23 = tpu.dynamic_rotate %1 by %c14_i32 dim 0 : vector<16x128xf32>, i32 -> vector<16x128xf32>
    %c6 = arith.constant 6 : index
    %24 = memref.load %arg1[%c6] : memref<54xf32, #tpu.memory_space<smem>>
    %25 = vector.broadcast %24 : f32 to vector<16x128xf32>
    %26 = arith.mulf %25, %23 : vector<16x128xf32>
    %27 = arith.addf %18, %26 : vector<16x128xf32>
    %c33 = arith.constant 33 : index
    %28 = memref.load %arg1[%c33] : memref<54xf32, #tpu.memory_space<smem>>
    %29 = vector.broadcast %28 : f32 to vector<16x128xf32>
    %30 = arith.mulf %29, %23 : vector<16x128xf32>
    %31 = arith.addf %22, %30 : vector<16x128xf32>
    %c127_i32 = arith.constant 127 : i32
    %32 = tpu.dynamic_rotate %1 by %c127_i32 dim 1 : vector<16x128xf32>, i32 -> vector<16x128xf32>
    %c1_4 = arith.constant 1 : index
    %33 = memref.load %arg1[%c1_4] : memref<54xf32, #tpu.memory_space<smem>>
    %34 = vector.broadcast %33 : f32 to vector<16x128xf32>
    %35 = arith.mulf %34, %32 : vector<16x128xf32>
    %36 = arith.addf %27, %35 : vector<16x128xf32>
    %c28 = arith.constant 28 : index
    %37 = memref.load %arg1[%c28] : memref<54xf32, #tpu.memory_space<smem>>
    %38 = vector.broadcast %37 : f32 to vector<16x128xf32>
    %39 = arith.mulf %38, %32 : vector<16x128xf32>
    %40 = arith.addf %31, %39 : vector<16x128xf32>
    %c15_i32_5 = arith.constant 15 : i32
    %41 = tpu.dynamic_rotate %32 by %c15_i32_5 dim 0 : vector<16x128xf32>, i32 -> vector<16x128xf32>
    %c4 = arith.constant 4 : index
    %42 = memref.load %arg1[%c4] : memref<54xf32, #tpu.memory_space<smem>>
    %43 = vector.broadcast %42 : f32 to vector<16x128xf32>
    %44 = arith.mulf %43, %41 : vector<16x128xf32>
    %45 = arith.addf %36, %44 : vector<16x128xf32>
    %c31 = arith.constant 31 : index
    %46 = memref.load %arg1[%c31] : memref<54xf32, #tpu.memory_space<smem>>
    %47 = vector.broadcast %46 : f32 to vector<16x128xf32>
    %48 = arith.mulf %47, %41 : vector<16x128xf32>
    %49 = arith.addf %40, %48 : vector<16x128xf32>
    %c14_i32_6 = arith.constant 14 : i32
    %50 = tpu.dynamic_rotate %32 by %c14_i32_6 dim 0 : vector<16x128xf32>, i32 -> vector<16x128xf32>
    %c7 = arith.constant 7 : index
    %51 = memref.load %arg1[%c7] : memref<54xf32, #tpu.memory_space<smem>>
    %52 = vector.broadcast %51 : f32 to vector<16x128xf32>
    %53 = arith.mulf %52, %50 : vector<16x128xf32>
    %54 = arith.addf %45, %53 : vector<16x128xf32>
    %c34 = arith.constant 34 : index
    %55 = memref.load %arg1[%c34] : memref<54xf32, #tpu.memory_space<smem>>
    %56 = vector.broadcast %55 : f32 to vector<16x128xf32>
    %57 = arith.mulf %56, %50 : vector<16x128xf32>
    %58 = arith.addf %49, %57 : vector<16x128xf32>
    %c126_i32 = arith.constant 126 : i32
    %59 = tpu.dynamic_rotate %1 by %c126_i32 dim 1 : vector<16x128xf32>, i32 -> vector<16x128xf32>
    %c2 = arith.constant 2 : index
    %60 = memref.load %arg1[%c2] : memref<54xf32, #tpu.memory_space<smem>>
    %61 = vector.broadcast %60 : f32 to vector<16x128xf32>
    %62 = arith.mulf %61, %59 : vector<16x128xf32>
    %63 = arith.addf %54, %62 : vector<16x128xf32>
    %c29 = arith.constant 29 : index
    %64 = memref.load %arg1[%c29] : memref<54xf32, #tpu.memory_space<smem>>
    %65 = vector.broadcast %64 : f32 to vector<16x128xf32>
    %66 = arith.mulf %65, %59 : vector<16x128xf32>
    %67 = arith.addf %58, %66 : vector<16x128xf32>
    %c15_i32_7 = arith.constant 15 : i32
    %68 = tpu.dynamic_rotate %59 by %c15_i32_7 dim 0 : vector<16x128xf32>, i32 -> vector<16x128xf32>
    %c5 = arith.constant 5 : index
    %69 = memref.load %arg1[%c5] : memref<54xf32, #tpu.memory_space<smem>>
    %70 = vector.broadcast %69 : f32 to vector<16x128xf32>
    %71 = arith.mulf %70, %68 : vector<16x128xf32>
    %72 = arith.addf %63, %71 : vector<16x128xf32>
    %c32 = arith.constant 32 : index
    %73 = memref.load %arg1[%c32] : memref<54xf32, #tpu.memory_space<smem>>
    %74 = vector.broadcast %73 : f32 to vector<16x128xf32>
    %75 = arith.mulf %74, %68 : vector<16x128xf32>
    %76 = arith.addf %67, %75 : vector<16x128xf32>
    %c14_i32_8 = arith.constant 14 : i32
    %77 = tpu.dynamic_rotate %59 by %c14_i32_8 dim 0 : vector<16x128xf32>, i32 -> vector<16x128xf32>
    %c8 = arith.constant 8 : index
    %78 = memref.load %arg1[%c8] : memref<54xf32, #tpu.memory_space<smem>>
    %79 = vector.broadcast %78 : f32 to vector<16x128xf32>
    %80 = arith.mulf %79, %77 : vector<16x128xf32>
    %81 = arith.addf %72, %80 : vector<16x128xf32>
    %c35 = arith.constant 35 : index
    %82 = memref.load %arg1[%c35] : memref<54xf32, #tpu.memory_space<smem>>
    %83 = vector.broadcast %82 : f32 to vector<16x128xf32>
    %84 = arith.mulf %83, %77 : vector<16x128xf32>
    %85 = arith.addf %76, %84 : vector<16x128xf32>
    %c1_9 = arith.constant 1 : index
    %c0_10 = arith.constant 0 : index
    %c0_11 = arith.constant 0 : index
    %86 = vector.load %arg0[%c1_9, %c0_10, %c0_11] : memref<3x16x128xf32, #tpu.memory_space<vmem>>, vector<1x16x128xf32>
    %87 = vector.shape_cast %86 : vector<1x16x128xf32> to vector<16x128xf32>
    %c9 = arith.constant 9 : index
    %88 = memref.load %arg1[%c9] : memref<54xf32, #tpu.memory_space<smem>>
    %89 = vector.broadcast %88 : f32 to vector<16x128xf32>
    %90 = arith.mulf %89, %87 : vector<16x128xf32>
    %c36 = arith.constant 36 : index
    %91 = memref.load %arg1[%c36] : memref<54xf32, #tpu.memory_space<smem>>
    %92 = vector.broadcast %91 : f32 to vector<16x128xf32>
    %93 = arith.mulf %92, %87 : vector<16x128xf32>
    %c15_i32_12 = arith.constant 15 : i32
    %94 = tpu.dynamic_rotate %87 by %c15_i32_12 dim 0 : vector<16x128xf32>, i32 -> vector<16x128xf32>
    %c12 = arith.constant 12 : index
    %95 = memref.load %arg1[%c12] : memref<54xf32, #tpu.memory_space<smem>>
    %96 = vector.broadcast %95 : f32 to vector<16x128xf32>
    %97 = arith.mulf %96, %94 : vector<16x128xf32>
    %98 = arith.addf %90, %97 : vector<16x128xf32>
    %c39 = arith.constant 39 : index
    %99 = memref.load %arg1[%c39] : memref<54xf32, #tpu.memory_space<smem>>
    %100 = vector.broadcast %99 : f32 to vector<16x128xf32>
    %101 = arith.mulf %100, %94 : vector<16x128xf32>
    %102 = arith.addf %93, %101 : vector<16x128xf32>
    %c14_i32_13 = arith.constant 14 : i32
    %103 = tpu.dynamic_rotate %87 by %c14_i32_13 dim 0 : vector<16x128xf32>, i32 -> vector<16x128xf32>
    %c15 = arith.constant 15 : index
    %104 = memref.load %arg1[%c15] : memref<54xf32, #tpu.memory_space<smem>>
    %105 = vector.broadcast %104 : f32 to vector<16x128xf32>
    %106 = arith.mulf %105, %103 : vector<16x128xf32>
    %107 = arith.addf %98, %106 : vector<16x128xf32>
    %c42 = arith.constant 42 : index
    %108 = memref.load %arg1[%c42] : memref<54xf32, #tpu.memory_space<smem>>
    %109 = vector.broadcast %108 : f32 to vector<16x128xf32>
    %110 = arith.mulf %109, %103 : vector<16x128xf32>
    %111 = arith.addf %102, %110 : vector<16x128xf32>
    %c127_i32_14 = arith.constant 127 : i32
    %112 = tpu.dynamic_rotate %87 by %c127_i32_14 dim 1 : vector<16x128xf32>, i32 -> vector<16x128xf32>
    %c10 = arith.constant 10 : index
    %113 = memref.load %arg1[%c10] : memref<54xf32, #tpu.memory_space<smem>>
    %114 = vector.broadcast %113 : f32 to vector<16x128xf32>
    %115 = arith.mulf %114, %112 : vector<16x128xf32>
    %116 = arith.addf %107, %115 : vector<16x128xf32>
    %c37 = arith.constant 37 : index
    %117 = memref.load %arg1[%c37] : memref<54xf32, #tpu.memory_space<smem>>
    %118 = vector.broadcast %117 : f32 to vector<16x128xf32>
    %119 = arith.mulf %118, %112 : vector<16x128xf32>
    %120 = arith.addf %111, %119 : vector<16x128xf32>
    %c15_i32_15 = arith.constant 15 : i32
    %121 = tpu.dynamic_rotate %112 by %c15_i32_15 dim 0 : vector<16x128xf32>, i32 -> vector<16x128xf32>
    %c13 = arith.constant 13 : index
    %122 = memref.load %arg1[%c13] : memref<54xf32, #tpu.memory_space<smem>>
    %123 = vector.broadcast %122 : f32 to vector<16x128xf32>
    %124 = arith.mulf %123, %121 : vector<16x128xf32>
    %125 = arith.addf %116, %124 : vector<16x128xf32>
    %c40 = arith.constant 40 : index
    %126 = memref.load %arg1[%c40] : memref<54xf32, #tpu.memory_space<smem>>
    %127 = vector.broadcast %126 : f32 to vector<16x128xf32>
    %128 = arith.mulf %127, %121 : vector<16x128xf32>
    %129 = arith.addf %120, %128 : vector<16x128xf32>
    %c14_i32_16 = arith.constant 14 : i32
    %130 = tpu.dynamic_rotate %112 by %c14_i32_16 dim 0 : vector<16x128xf32>, i32 -> vector<16x128xf32>
    %c16 = arith.constant 16 : index
    %131 = memref.load %arg1[%c16] : memref<54xf32, #tpu.memory_space<smem>>
    %132 = vector.broadcast %131 : f32 to vector<16x128xf32>
    %133 = arith.mulf %132, %130 : vector<16x128xf32>
    %134 = arith.addf %125, %133 : vector<16x128xf32>
    %c43 = arith.constant 43 : index
    %135 = memref.load %arg1[%c43] : memref<54xf32, #tpu.memory_space<smem>>
    %136 = vector.broadcast %135 : f32 to vector<16x128xf32>
    %137 = arith.mulf %136, %130 : vector<16x128xf32>
    %138 = arith.addf %129, %137 : vector<16x128xf32>
    %c126_i32_17 = arith.constant 126 : i32
    %139 = tpu.dynamic_rotate %87 by %c126_i32_17 dim 1 : vector<16x128xf32>, i32 -> vector<16x128xf32>
    %c11 = arith.constant 11 : index
    %140 = memref.load %arg1[%c11] : memref<54xf32, #tpu.memory_space<smem>>
    %141 = vector.broadcast %140 : f32 to vector<16x128xf32>
    %142 = arith.mulf %141, %139 : vector<16x128xf32>
    %143 = arith.addf %134, %142 : vector<16x128xf32>
    %c38 = arith.constant 38 : index
    %144 = memref.load %arg1[%c38] : memref<54xf32, #tpu.memory_space<smem>>
    %145 = vector.broadcast %144 : f32 to vector<16x128xf32>
    %146 = arith.mulf %145, %139 : vector<16x128xf32>
    %147 = arith.addf %138, %146 : vector<16x128xf32>
    %c15_i32_18 = arith.constant 15 : i32
    %148 = tpu.dynamic_rotate %139 by %c15_i32_18 dim 0 : vector<16x128xf32>, i32 -> vector<16x128xf32>
    %c14 = arith.constant 14 : index
    %149 = memref.load %arg1[%c14] : memref<54xf32, #tpu.memory_space<smem>>
    %150 = vector.broadcast %149 : f32 to vector<16x128xf32>
    %151 = arith.mulf %150, %148 : vector<16x128xf32>
    %152 = arith.addf %143, %151 : vector<16x128xf32>
    %c41 = arith.constant 41 : index
    %153 = memref.load %arg1[%c41] : memref<54xf32, #tpu.memory_space<smem>>
    %154 = vector.broadcast %153 : f32 to vector<16x128xf32>
    %155 = arith.mulf %154, %148 : vector<16x128xf32>
    %156 = arith.addf %147, %155 : vector<16x128xf32>
    %c14_i32_19 = arith.constant 14 : i32
    %157 = tpu.dynamic_rotate %139 by %c14_i32_19 dim 0 : vector<16x128xf32>, i32 -> vector<16x128xf32>
    %c17 = arith.constant 17 : index
    %158 = memref.load %arg1[%c17] : memref<54xf32, #tpu.memory_space<smem>>
    %159 = vector.broadcast %158 : f32 to vector<16x128xf32>
    %160 = arith.mulf %159, %157 : vector<16x128xf32>
    %161 = arith.addf %152, %160 : vector<16x128xf32>
    %c44 = arith.constant 44 : index
    %162 = memref.load %arg1[%c44] : memref<54xf32, #tpu.memory_space<smem>>
    %163 = vector.broadcast %162 : f32 to vector<16x128xf32>
    %164 = arith.mulf %163, %157 : vector<16x128xf32>
    %165 = arith.addf %156, %164 : vector<16x128xf32>
    %c2_20 = arith.constant 2 : index
    %c0_21 = arith.constant 0 : index
    %c0_22 = arith.constant 0 : index
    %166 = vector.load %arg0[%c2_20, %c0_21, %c0_22] : memref<3x16x128xf32, #tpu.memory_space<vmem>>, vector<1x16x128xf32>
    %167 = vector.shape_cast %166 : vector<1x16x128xf32> to vector<16x128xf32>
    %c18 = arith.constant 18 : index
    %168 = memref.load %arg1[%c18] : memref<54xf32, #tpu.memory_space<smem>>
    %169 = vector.broadcast %168 : f32 to vector<16x128xf32>
    %170 = arith.mulf %169, %167 : vector<16x128xf32>
    %c45 = arith.constant 45 : index
    %171 = memref.load %arg1[%c45] : memref<54xf32, #tpu.memory_space<smem>>
    %172 = vector.broadcast %171 : f32 to vector<16x128xf32>
    %173 = arith.mulf %172, %167 : vector<16x128xf32>
    %c15_i32_23 = arith.constant 15 : i32
    %174 = tpu.dynamic_rotate %167 by %c15_i32_23 dim 0 : vector<16x128xf32>, i32 -> vector<16x128xf32>
    %c21 = arith.constant 21 : index
    %175 = memref.load %arg1[%c21] : memref<54xf32, #tpu.memory_space<smem>>
    %176 = vector.broadcast %175 : f32 to vector<16x128xf32>
    %177 = arith.mulf %176, %174 : vector<16x128xf32>
    %178 = arith.addf %170, %177 : vector<16x128xf32>
    %c48 = arith.constant 48 : index
    %179 = memref.load %arg1[%c48] : memref<54xf32, #tpu.memory_space<smem>>
    %180 = vector.broadcast %179 : f32 to vector<16x128xf32>
    %181 = arith.mulf %180, %174 : vector<16x128xf32>
    %182 = arith.addf %173, %181 : vector<16x128xf32>
    %c14_i32_24 = arith.constant 14 : i32
    %183 = tpu.dynamic_rotate %167 by %c14_i32_24 dim 0 : vector<16x128xf32>, i32 -> vector<16x128xf32>
    %c24 = arith.constant 24 : index
    %184 = memref.load %arg1[%c24] : memref<54xf32, #tpu.memory_space<smem>>
    %185 = vector.broadcast %184 : f32 to vector<16x128xf32>
    %186 = arith.mulf %185, %183 : vector<16x128xf32>
    %187 = arith.addf %178, %186 : vector<16x128xf32>
    %c51 = arith.constant 51 : index
    %188 = memref.load %arg1[%c51] : memref<54xf32, #tpu.memory_space<smem>>
    %189 = vector.broadcast %188 : f32 to vector<16x128xf32>
    %190 = arith.mulf %189, %183 : vector<16x128xf32>
    %191 = arith.addf %182, %190 : vector<16x128xf32>
    %c127_i32_25 = arith.constant 127 : i32
    %192 = tpu.dynamic_rotate %167 by %c127_i32_25 dim 1 : vector<16x128xf32>, i32 -> vector<16x128xf32>
    %c19 = arith.constant 19 : index
    %193 = memref.load %arg1[%c19] : memref<54xf32, #tpu.memory_space<smem>>
    %194 = vector.broadcast %193 : f32 to vector<16x128xf32>
    %195 = arith.mulf %194, %192 : vector<16x128xf32>
    %196 = arith.addf %187, %195 : vector<16x128xf32>
    %c46 = arith.constant 46 : index
    %197 = memref.load %arg1[%c46] : memref<54xf32, #tpu.memory_space<smem>>
    %198 = vector.broadcast %197 : f32 to vector<16x128xf32>
    %199 = arith.mulf %198, %192 : vector<16x128xf32>
    %200 = arith.addf %191, %199 : vector<16x128xf32>
    %c15_i32_26 = arith.constant 15 : i32
    %201 = tpu.dynamic_rotate %192 by %c15_i32_26 dim 0 : vector<16x128xf32>, i32 -> vector<16x128xf32>
    %c22 = arith.constant 22 : index
    %202 = memref.load %arg1[%c22] : memref<54xf32, #tpu.memory_space<smem>>
    %203 = vector.broadcast %202 : f32 to vector<16x128xf32>
    %204 = arith.mulf %203, %201 : vector<16x128xf32>
    %205 = arith.addf %196, %204 : vector<16x128xf32>
    %c49 = arith.constant 49 : index
    %206 = memref.load %arg1[%c49] : memref<54xf32, #tpu.memory_space<smem>>
    %207 = vector.broadcast %206 : f32 to vector<16x128xf32>
    %208 = arith.mulf %207, %201 : vector<16x128xf32>
    %209 = arith.addf %200, %208 : vector<16x128xf32>
    %c14_i32_27 = arith.constant 14 : i32
    %210 = tpu.dynamic_rotate %192 by %c14_i32_27 dim 0 : vector<16x128xf32>, i32 -> vector<16x128xf32>
    %c25 = arith.constant 25 : index
    %211 = memref.load %arg1[%c25] : memref<54xf32, #tpu.memory_space<smem>>
    %212 = vector.broadcast %211 : f32 to vector<16x128xf32>
    %213 = arith.mulf %212, %210 : vector<16x128xf32>
    %214 = arith.addf %205, %213 : vector<16x128xf32>
    %c52 = arith.constant 52 : index
    %215 = memref.load %arg1[%c52] : memref<54xf32, #tpu.memory_space<smem>>
    %216 = vector.broadcast %215 : f32 to vector<16x128xf32>
    %217 = arith.mulf %216, %210 : vector<16x128xf32>
    %218 = arith.addf %209, %217 : vector<16x128xf32>
    %c126_i32_28 = arith.constant 126 : i32
    %219 = tpu.dynamic_rotate %167 by %c126_i32_28 dim 1 : vector<16x128xf32>, i32 -> vector<16x128xf32>
    %c20 = arith.constant 20 : index
    %220 = memref.load %arg1[%c20] : memref<54xf32, #tpu.memory_space<smem>>
    %221 = vector.broadcast %220 : f32 to vector<16x128xf32>
    %222 = arith.mulf %221, %219 : vector<16x128xf32>
    %223 = arith.addf %214, %222 : vector<16x128xf32>
    %c47 = arith.constant 47 : index
    %224 = memref.load %arg1[%c47] : memref<54xf32, #tpu.memory_space<smem>>
    %225 = vector.broadcast %224 : f32 to vector<16x128xf32>
    %226 = arith.mulf %225, %219 : vector<16x128xf32>
    %227 = arith.addf %218, %226 : vector<16x128xf32>
    %c15_i32_29 = arith.constant 15 : i32
    %228 = tpu.dynamic_rotate %219 by %c15_i32_29 dim 0 : vector<16x128xf32>, i32 -> vector<16x128xf32>
    %c23 = arith.constant 23 : index
    %229 = memref.load %arg1[%c23] : memref<54xf32, #tpu.memory_space<smem>>
    %230 = vector.broadcast %229 : f32 to vector<16x128xf32>
    %231 = arith.mulf %230, %228 : vector<16x128xf32>
    %232 = arith.addf %223, %231 : vector<16x128xf32>
    %c50 = arith.constant 50 : index
    %233 = memref.load %arg1[%c50] : memref<54xf32, #tpu.memory_space<smem>>
    %234 = vector.broadcast %233 : f32 to vector<16x128xf32>
    %235 = arith.mulf %234, %228 : vector<16x128xf32>
    %236 = arith.addf %227, %235 : vector<16x128xf32>
    %c14_i32_30 = arith.constant 14 : i32
    %237 = tpu.dynamic_rotate %219 by %c14_i32_30 dim 0 : vector<16x128xf32>, i32 -> vector<16x128xf32>
    %c26 = arith.constant 26 : index
    %238 = memref.load %arg1[%c26] : memref<54xf32, #tpu.memory_space<smem>>
    %239 = vector.broadcast %238 : f32 to vector<16x128xf32>
    %240 = arith.mulf %239, %237 : vector<16x128xf32>
    %241 = arith.addf %232, %240 : vector<16x128xf32>
    %c53 = arith.constant 53 : index
    %242 = memref.load %arg1[%c53] : memref<54xf32, #tpu.memory_space<smem>>
    %243 = vector.broadcast %242 : f32 to vector<16x128xf32>
    %244 = arith.mulf %243, %237 : vector<16x128xf32>
    %245 = arith.addf %236, %244 : vector<16x128xf32>
    %246 = arith.addf %81, %161 : vector<16x128xf32>
    %247 = arith.addf %246, %241 : vector<16x128xf32>
    %c0_31 = arith.constant 0 : index
    %c0_32 = arith.constant 0 : index
    %c0_33 = arith.constant 0 : index
    %248 = vector.load %arg3[%c0_31, %c0_32, %c0_33] : memref<2x16x128xf32, #tpu.memory_space<vmem>>, vector<1x16x128xf32>
    %249 = vector.shape_cast %248 : vector<1x16x128xf32> to vector<16x128xf32>
    %250 = vector.shape_cast %247 : vector<16x128xf32> to vector<1x16x128xf32>
    tpu.vector_store %arg3[%c0_31, %c0_32, %c0_33], %250 {strides = array<i32>} : memref<2x16x128xf32, #tpu.memory_space<vmem>>, vector<1x16x128xf32>,
    %251 = arith.addf %85, %165 : vector<16x128xf32>
    %252 = arith.addf %251, %245 : vector<16x128xf32>
    %c1_34 = arith.constant 1 : index
    %c0_35 = arith.constant 0 : index
    %c0_36 = arith.constant 0 : index
    %253 = vector.load %arg3[%c1_34, %c0_35, %c0_36] : memref<2x16x128xf32, #tpu.memory_space<vmem>>, vector<1x16x128xf32>
    %254 = vector.shape_cast %253 : vector<1x16x128xf32> to vector<16x128xf32>
    %255 = vector.shape_cast %252 : vector<16x128xf32> to vector<1x16x128xf32>
    tpu.vector_store %arg3[%c1_34, %c0_35, %c0_36], %255 {strides = array<i32>} : memref<2x16x128xf32, #tpu.memory_space<vmem>>, vector<1x16x128xf32>,
    return
  }
}

</mosaic_0001>

<bundles_post_ra>
// kernel: model_forward.1
= control target key start
LH: loop header
LB: loop body
LE: loop exit
PB: predicated region body
PF: predicated region fallthrough
CT: control target
= control target key end

     0   :  { %8 = vsyncpa [#allocation3], 0  ;;  %s1244_s0 = inlined_call_operand.vmem [shape: f32[3,16,128], index: 0, kind: input, shape index: {}]   ;;  %s1245_s1 = inlined_call_operand.vmem [shape: f32[54], index: 1, kind: input, shape index: {}]   ;;  %s1246_s2 = inlined_call_operand.vmem [shape: f32[2], index: 2, kind: input, shape index: {}]   ;;  %s1247_s3 = inlined_call_operand.vmem [shape: f32[2,16,128], index: 3, kind: output, shape index: {}]  }
   0x1   :  { %s17_s14 = sshll.u32 %s1245_s1, 4  ;;  %s18_s14 = int_to_ptr.vmem [resolvable:$true] %s17_s14 }
   0x2   :  { %9 = vsyncpa [#allocation5], 0  ;;  %s26_s17 = sshll.u32 %s1246_s2, 4  ;;  %s578_s18 = smov [#allocation2]   ;;  %s27_s17 = int_to_ptr.vmem [resolvable:$true] %s26_s17 }
   0x3   :  { %20 = dma.vmem_to_smem %s18_s14, 16, %s578_s18, [#allocation3]  }
   0x4   :  { %s579_s19 = smov [#allocation4]  }
   0x5   :  { %29 = dma.vmem_to_smem %s27_s17, 16, %s579_s19, [#allocation5]  }
   0x6   :  { %574 = dma.done.wait [#allocation3], 16  }
   0x7   :  { %575 = vsyncadd [#allocation3], 4294967280 }
   0x8   :  { %576 = dma.done.wait [#allocation5], 16  }
   0x9   :  { %577 = vsyncadd [#allocation5], 4294967280 }
   0xa   :  { %38 = sfence }
   0xb   :  { %v611_v0 = vld [vmem:[%s1244_s0 + $0x10] sm:$0xff]  ;;  %v616_v1 = vld [vmem:[%s1244_s0] sm:$0xff]  ;;  %s580_s24 = smov 127   ;;  %v626_v3 = vld [vmem:[%s1244_s0 + $0x18] sm:$0xff]  ;;  %s581_s4 = smov 126   ;;  %v59_v8 = vlaneseq }
   0xc   :  { %v524_v2 = vld [vmem:[%s1244_s0 + $0x20] sm:$0xff]  ;;  %232 = vrot.lane.b32.xlu1 %v611_v0, %s580_s24  ;;  %93 = vrot.lane.b32.xlu0 %v616_v1, %s580_s24  ;;  %v631_v4 = vld [vmem:[%s1244_s0 + $0x8] sm:$0xff]  ;;  %s526_s5 = sld [smem:[#allocation2 + $0x12]]  ;;  %v200_v42 = vrot.slane %v611_v0, 1  ;;  %v201_v43 = vrot.slane %v626_v3, 1  ;;  %v57_v44 = vrot.slane %v616_v1, 1 }
   0xd   :  { %371 = vrot.lane.b32.xlu2 %v524_v2, %s580_s24  ;;  %v525_v5 = vld [vmem:[%s1244_s0 + $0x28] sm:$0xff]  ;;  %s527_s6 = sld [smem:[#allocation2 + $0x2d]]  ;;  %v339_v6 = vrot.slane %v524_v2, 1  ;;  %v355_v7 = vrot.slane %v524_v2, 2  ;;  %v650_v13 = vshrl.u32 %v59_v8, 7  ;;  %v58_v47 = vrot.slane %v631_v4, 1 }
   0xe   :  { %s642_s7 = sld [smem:[#allocation2 + $0x15]]  ;;  %v340_v9 = vrot.slane %v525_v5, 1  ;;  %v356_v12 = vrot.slane %v525_v5, 2  ;;  %v216_v52 = vrot.slane %v611_v0, 2  ;;  %v217_v53 = vrot.slane %v626_v3, 2 }
   0xf   :  { %s644_s0 = sld [smem:[#allocation2 + $0x30]]  ;;  %vm61_vm0 = vcmp.lt.s32.totalorder %v650_v13, 7  ;;  %vm78_vm1 = vcmp.lt.s32.totalorder %v650_v13, 6  ;;  %v77_v62 = vrot.slane %v631_v4, 2 }
  0x10   :  { %s646_s8 = sld [smem:[#allocation2 + $0x18]]  ;;  %v341_v20 = vsel %vm61_vm0, %v339_v6, %v340_v9  ;;  %v357_v21 = vsel %vm78_vm1, %v355_v7, %v356_v12  ;;  %v342_v30 = vsel %vm61_vm0, %v340_v9, %v339_v6  ;;  %v358_v31 = vsel %vm78_vm1, %v356_v12, %v355_v7 }
  0x11   :  { %s648_s9 = sld [smem:[#allocation2 + $0x33]]  ;;  %v202_v49 = vsel %vm61_vm0, %v200_v42, %v201_v43  ;;  %v62_v63 = vsel %vm61_vm0, %v57_v44, %v58_v47  ;;  %v218_v8 = vsel %vm78_vm1, %v216_v52, %v217_v53 }
  0x12   :  { %v332_v10 = vstv %s526_s5  ;;  %s662_s10 = sld [smem:[#allocation2 + $0x13]] }
  0x13   :  { %v336_v11 = vstv %s527_s6  ;;  %v333_v18 = vmul.f32 %v524_v2, %v332_v10  ;;  %v334_v26 = vmul.f32 %v525_v5, %v332_v10  ;;  %s668_s11 = sld [smem:[#allocation2 + $0x2e]] }
  0x14   :  { %234 = vrot.lane.b32.xlu1 %v626_v3, %s580_s24  ;;  %95 = vrot.lane.b32.xlu0 %v631_v4, %s580_s24  ;;  %v344_v14 = vstv %s642_s7  ;;  %v337_v19 = vmul.f32 %v524_v2, %v336_v11  ;;  %v338_v27 = vmul.f32 %v525_v5, %v336_v11  ;;  %s674_s12 = sld [smem:[#allocation2 + $0x16]] }
  0x15   :  { %373 = vrot.lane.b32.xlu2 %v525_v5, %s580_s24  ;;  %v350_v15 = vstv %s644_s0  ;;  %v345_v22 = vmul.f32 %v344_v14, %v341_v20  ;;  %v346_v32 = vmul.f32 %v344_v14, %v342_v30  ;;  %s676_s13 = sld [smem:[#allocation2 + $0x31]] }
  0x16   :  { %v360_v16 = vstv %s646_s8  ;;  %v351_v23 = vmul.f32 %v350_v15, %v341_v20  ;;  %v352_v33 = vmul.f32 %v350_v15, %v342_v30  ;;  %s678_s14 = sld [smem:[#allocation2 + $0x9]] }
  0x17   :  { %v366_v17 = vstv %s648_s9  ;;  %v361_v24 = vmul.f32 %v360_v16, %v357_v21  ;;  %v347_v28 = vadd.f32 %v345_v22, %v333_v18  ;;  %v362_v34 = vmul.f32 %v360_v16, %v358_v31  ;;  %s684_s15 = sld [smem:[#allocation2 + $0x24]] }
  0x18   :  { %v367_v25 = vmul.f32 %v366_v17, %v357_v21  ;;  %v353_v29 = vadd.f32 %v351_v23, %v337_v19  ;;  %v368_v35 = vmul.f32 %v366_v17, %v358_v31  ;;  %v348_v38 = vadd.f32 %v346_v32, %v334_v26  ;;  %s686_s16 = sld [smem:[#allocation2 + $0xc]] }
  0x19   :  { %v670_v36 = vadd.f32 %v361_v24, %v347_v28  ;;  %v354_v39 = vadd.f32 %v352_v33, %v338_v27  ;;  %s688_s17 = sld [smem:[#allocation2 + $0x27]]  ;;  %v376_v9 = vstv %s662_s10  ;;  %v382_v22 = vstv %s668_s11 }
  0x1a   :  { %v672_v37 = vadd.f32 %v367_v25, %v353_v29  ;;  %v680_v40 = vadd.f32 %v362_v34, %v348_v38  ;;  %s690_s18 = sld [smem:[#allocation2 + $0xf]]  ;;  %v392_v23 = vstv %s674_s12  ;;  %v203_v33 = vsel %vm61_vm0, %v201_v43, %v200_v42 }
  0x1b   :  { %v682_v41 = vadd.f32 %v368_v35, %v354_v39  ;;  %s692_s19 = sld [smem:[#allocation2 + $0x2a]]  ;;  %v398_v24 = vstv %s676_s13 }
  0x1c   :  { %143 = vrot.lane.b32.xlu1 %v631_v4, %s581_s4  ;;  %141 = vrot.lane.b32.xlu0 %v616_v1, %s581_s4  ;;  %s694_s20 = sld [smem:[#allocation2 + $0xa]]  ;;  %v193_v45 = vstv %s678_s14 }
  0x1d   :  { %280 = vrot.lane.b32.xlu2 %v611_v0, %s581_s4  ;;  %s696_s21 = sld [smem:[#allocation2]]  ;;  %v197_v46 = vstv %s684_s15  ;;  %v194_v54 = vmul.f32 %v611_v0, %v193_v45  ;;  %v195_v42 = vmul.f32 %v626_v3, %v193_v45 }
  0x1e   :  { %s698_s1 = sld [smem:[#allocation4]]  ;;  %v205_v48 = vstv %s686_s16  ;;  %v198_v55 = vmul.f32 %v611_v0, %v197_v46  ;;  %v199_v43 = vmul.f32 %v626_v3, %v197_v46 }
  0x1f   :  { %s700_s22 = sld [smem:[#allocation2 + $0x1b]]  ;;  %v211_v51 = vstv %s688_s17  ;;  %v206_v57 = vmul.f32 %v205_v48, %v202_v49 }
  0x20   :  { %s702_s2 = sld [smem:[#allocation2 + $0x3]]  ;;  %v212_v61 = vmul.f32 %v211_v51, %v202_v49  ;;  %v221_v6 = vstv %s690_s18 }
  0x21   :  { %s706_s23 = sld [smem:[#allocation4 + $0x1]]  ;;  %v227_v7 = vstv %s692_s19  ;;  %v208_v14 = vadd.f32 %v206_v57, %v194_v54  ;;  %v222_v19 = vmul.f32 %v221_v6, %v218_v8 }
  0x22   :  { %s708_s24 = sld [smem:[#allocation2 + $0x1e]]  ;;  %v214_v18 = vadd.f32 %v212_v61, %v198_v55  ;;  %v228_v20 = vmul.f32 %v227_v7, %v218_v8  ;;  %v237_v25 = vstv %s694_s20  ;;  %v213_v61 = vmul.f32 %v211_v51, %v203_v33 }
  0x23   :  { %s710_s25 = sld [smem:[#allocation2 + $0x6]]  ;;  %v42_v50 = vstv %s696_s21  ;;  %v819_v34 = vadd.f32 %v222_v19, %v208_v14 }
  0x24   :  { %419 = vrot.lane.b32.xlu1 %v524_v2, %s581_s4  ;;  %282 = vrot.lane.b32.xlu0 %v626_v3, %s581_s4  ;;  %s715_s26 = sld [smem:[#allocation2 + $0x25]]  ;;  %v46_v56 = vstv %s698_s1  ;;  %v43_v60 = vmul.f32 %v42_v50, %v616_v1  ;;  %v76_v2 = vrot.slane %v616_v1, 2  ;;  %v821_v35 = vadd.f32 %v228_v20, %v214_v18 }
  0x25   :  { %421 = vrot.lane.b32.xlu2 %v525_v5, %s581_s4  ;;  %s726_s27 = sld [smem:[#allocation2 + $0x21]]  ;;  %v50_v58 = vstv %s700_s22  ;;  %v44_v0 = vmul.f32 %v42_v50, %v631_v4  ;;  %v215_v50 = vadd.f32 %v213_v61, %v199_v43 }
  0x26   :  { %s731_s28 = sld [smem:[#allocation2 + $0x1]]  ;;  %v65_v59 = vstv %s702_s2  ;;  %v47_v15 = vadd.f32 %v46_v56, %v43_v60  ;;  %v51_v16 = vmul.f32 %v50_v58, %v616_v1  ;;  %v79_v21 = vsel %vm78_vm1, %v76_v2, %v77_v62 }
  0x27   :  { %s740_s29 = sld [smem:[#allocation2 + $0x1c]]  ;;  %v54_v10 = vstv %s706_s23  ;;  %v66_v17 = vmul.f32 %v65_v59, %v62_v63  ;;  %v207_v60 = vmul.f32 %v205_v48, %v203_v33  ;;  %v52_v3 = vmul.f32 %v50_v58, %v631_v4 }
  0x28   :  { %s749_s30 = sld [smem:[#allocation2 + $0x19]]  ;;  %v71_v11 = vstv %s708_s24  ;;  %v55_v30 = vadd.f32 %v54_v10, %v51_v16  ;;  %v63_v58 = vsel %vm61_vm0, %v58_v47, %v57_v44  ;;  %v48_v44 = vadd.f32 %v46_v56, %v44_v0 }
  0x29   :  { %s761_s4 = sld [smem:[#allocation2 + $0x34]]  ;;  %v82_v12 = vstv %s710_s25  ;;  %v72_v29 = vmul.f32 %v71_v11, %v62_v63  ;;  %v68_v31 = vadd.f32 %v66_v17, %v47_v15  ;;  %v219_v63 = vsel %vm78_vm1, %v217_v53, %v216_v52 }
  0x2a   :  { %s773_s5 = sld [smem:[#allocation2 + $0x14]]  ;;  %v243_v26 = vstv %s715_s26  ;;  %v83_v32 = vmul.f32 %v82_v12, %v79_v21  ;;  %v223_v53 = vmul.f32 %v221_v6, %v219_v63  ;;  %v229_v16 = vmul.f32 %v227_v7, %v219_v63 }
  0x2b   :  { %s779_s6 = sld [smem:[#allocation2 + $0x2f]]  ;;  %v88_v27 = vstv %s726_s27  ;;  %v74_v45 = vadd.f32 %v72_v29, %v55_v30  ;;  %v209_v18 = vadd.f32 %v207_v60, %v195_v42  ;;  %v56_v47 = vadd.f32 %v54_v10, %v52_v3 }
  0x2c   :  { %s788_s7 = sld [smem:[#allocation2 + $0xd]]  ;;  %v98_v28 = vstv %s731_s28  ;;  %v89_v54 = vmul.f32 %v88_v27, %v79_v21  ;;  %v853_v8 = vadd.f32 %v83_v32, %v68_v31  ;;  %v80_v56 = vsel %vm78_vm1, %v77_v62, %v76_v2 }
  0x2d   :  { %s800_s0 = sld [smem:[#allocation2 + $0x28]]  ;;  %v104_v38 = vstv %s740_s29  ;;  %v84_v32 = vmul.f32 %v82_v12, %v80_v56 }
  0x2e   :  { %s817_s8 = sld [smem:[#allocation2 + $0x4]]  ;;  %v408_v39 = vstv %s749_s30  ;;  %v889_v20 = vadd.f32 %v89_v54, %v74_v45 }
  0x2f   :  { %s825_s9 = sld [smem:[#allocation2 + $0x1f]]  ;;  %v414_v55 = vstv %s761_s4 }
  0x30   :  { %v424_v57 = vstv %s773_s5  ;;  %s836_s11 = sld [smem:[#allocation2 + $0x7]] }
  0x31   :  { %s851_s14 = sld [smem:[#allocation2 + $0x22]]  ;;  %v430_v14 = vstv %s779_s6 }
  0x32   :  { %v253_v15 = vstv %s788_s7  ;;  %s857_s15 = sld [smem:[#allocation2 + $0x2]] }
  0x33   :  { %s867_s16 = sld [smem:[#allocation2 + $0x1d]]  ;;  %v259_v52 = vstv %s800_s0 }
  0x34   :  { %s873_s17 = sld [smem:[#allocation2 + $0x5]]  ;;  %v114_v54 = vstv %s817_s8 }
  0x35   :  { %s882_s18 = sld [smem:[#allocation2 + $0x20]]  ;;  %v120_v42 = vstv %s825_s9 }
  0x36   :  { %s891_s19 = sld [smem:[#allocation2 + $0x8]]  ;;  %v130_v12 = vstv %s836_s11 }
  0x37   :  { %s900_s21 = sld [smem:[#allocation2 + $0x23]]  ;;  %v136_v43 = vstv %s851_s14 }
  0x38   :  { %s914_s10 = sld [smem:[#allocation2 + $0x17]] }
  0x39   :  { %s924_s1 = sld [smem:[#allocation2 + $0x32]] }
  0x3a   :  { %s932_s22 = sld [smem:[#allocation2 + $0x1a]] }
  0x3b   :  { %s942_s2 = sld [smem:[#allocation2 + $0x10]] }
  0x3c   :  { %s948_s12 = sld [smem:[#allocation2 + $0x35]] }
  0x3d   :  { %s954_s23 = sld [smem:[#allocation2 + $0x2b]] }
  0x3e   :  { %s968_s13 = sld [smem:[#allocation2 + $0xb]] }
  0x3f   :  { %s972_s24 = sld [smem:[#allocation2 + $0x26]] }
  0x40   :  { %s991_s25 = sld [smem:[#allocation2 + $0xe]] }
  0x41   :  { %s1002_s27 = sld [smem:[#allocation2 + $0x29]] }
  0x42   :  { %s1008_s30 = sld [smem:[#allocation2 + $0x11]] }
  0x43   :  { %s1028_s4 = sld [smem:[#allocation2 + $0x2c]] }
  0x67   :  { %v763_v5 = vpop.permute.xlu2 %371 }
  0x68   :  { %v387_v46 = vrot.slane %v763_v5, 1  ;;  %v377_v51 = vmul.f32 %v376_v9, %v763_v5  ;;  %v383_v17 = vmul.f32 %v382_v22, %v763_v5  ;;  %v403_v6 = vrot.slane %v763_v5, 2 }
  0x6a   :  { %v379_v10 = vadd.f32 %v377_v51, %v670_v36  ;;  %v385_v30 = vadd.f32 %v383_v17, %v672_v37 }
  0x6f   :  { %v827_v49 = vpop.permute.xlu2 %373 }
  0x70   :  { %v388_v48 = vrot.slane %v827_v49, 1  ;;  %v378_v7 = vmul.f32 %v376_v9, %v827_v49  ;;  %v384_v19 = vmul.f32 %v382_v22, %v827_v49  ;;  %v404_v29 = vrot.slane %v827_v49, 2 }
  0x71   :  { %v67_v9 = vmul.f32 %v65_v59, %v63_v58  ;;  %v73_v22 = vmul.f32 %v71_v11, %v63_v58  ;;  %v920_v59 = vadd.f32 %v223_v53, %v209_v18  ;;  %v922_v11 = vadd.f32 %v229_v16, %v215_v50 }
  0x72   :  { %v390_v21 = vsel %vm61_vm0, %v388_v48, %v387_v46  ;;  %v389_v5 = vsel %vm61_vm0, %v387_v46, %v388_v48  ;;  %v380_v1 = vadd.f32 %v378_v7, %v680_v40  ;;  %v386_v4 = vadd.f32 %v384_v19, %v682_v41 }
  0x73   :  { %v394_v36 = vmul.f32 %v392_v23, %v390_v21  ;;  %v400_v37 = vmul.f32 %v398_v24, %v390_v21  ;;  %v393_v62 = vmul.f32 %v392_v23, %v389_v5  ;;  %v406_v2 = vsel %vm78_vm1, %v404_v29, %v403_v6 }
  0x74   :  { %v90_v40 = vmul.f32 %v88_v27, %v80_v56  ;;  %v399_v41 = vmul.f32 %v398_v24, %v389_v5  ;;  %v405_v33 = vsel %vm78_vm1, %v403_v6, %v404_v29  ;;  %v69_v49 = vadd.f32 %v67_v9, %v48_v44 }
  0x75   :  { %v75_v23 = vadd.f32 %v73_v22, %v56_v47  ;;  %v396_v27 = vadd.f32 %v394_v36, %v380_v1  ;;  %v402_v24 = vadd.f32 %v400_v37, %v386_v4  ;;  %v410_v60 = vmul.f32 %v408_v39, %v406_v2 }
  0x76   :  { %v416_v61 = vmul.f32 %v414_v55, %v406_v2  ;;  %v146_v46 = vstv %s857_s15  ;;  %v152_v48 = vstv %s867_s16  ;;  %v395_v0 = vadd.f32 %v393_v62, %v379_v10 }
  0x77   :  { %v918_v31 = vpop.permute.xlu2 %280  ;;  %v409_v3 = vmul.f32 %v408_v39, %v405_v33  ;;  %v86_v51 = vadd.f32 %v84_v32, %v69_v49  ;;  %v92_v53 = vadd.f32 %v90_v40, %v75_v23  ;;  %v401_v16 = vadd.f32 %v399_v41, %v385_v30 }
  0x78   :  { %v415_v17 = vmul.f32 %v414_v55, %v405_v33  ;;  %v162_v18 = vstv %s873_s17  ;;  %v168_v50 = vstv %s882_s18  ;;  %v178_v58 = vstv %s891_s19 }
  0x79   :  { %v184_v6 = vstv %s900_s21  ;;  %v296_v39 = vrot.slane %v918_v31, 1  ;;  %v412_v19 = vadd.f32 %v410_v60, %v396_v27  ;;  %v418_v21 = vadd.f32 %v416_v61, %v402_v24 }
  0x7a   :  { %v988_v47 = vadd.f32 %v409_v3, %v395_v0  ;;  %v269_v5 = vstv %s942_s2  ;;  %v999_v56 = vadd.f32 %v415_v17, %v401_v16  ;;  %v440_v10 = vstv %s914_s10 }
  0x7b   :  { %v446_v30 = vstv %s924_s1  ;;  %v456_v1 = vstv %s932_s22  ;;  %v275_v36 = vstv %s954_s23  ;;  %v285_v60 = vstv %s968_s13 }
  0x7e   :  { %v960_v63 = vpop.permute.xlu1 %232  ;;  %v962_v45 = vpop.permute.xlu0 %93 }
  0x7f   :  { %v238_v55 = vmul.f32 %v237_v25, %v960_v63  ;;  %v244_v29 = vmul.f32 %v243_v26, %v960_v63  ;;  %v986_v44 = vpop.permute.xlu2 %421  ;;  %v99_v9 = vmul.f32 %v98_v28, %v962_v45  ;;  %v105_v22 = vmul.f32 %v104_v38, %v962_v45 }
  0x80   :  { %v248_v37 = vrot.slane %v960_v63, 1  ;;  %v264_v62 = vrot.slane %v960_v63, 2  ;;  %v426_v2 = vmul.f32 %v424_v57, %v986_v44  ;;  %v432_v32 = vmul.f32 %v430_v14, %v986_v44 }
  0x81   :  { %v1019_v40 = vadd.f32 %v238_v55, %v819_v34  ;;  %v1022_v41 = vadd.f32 %v244_v29, %v821_v35  ;;  %v109_v33 = vrot.slane %v962_v45, 1  ;;  %v125_v49 = vrot.slane %v962_v45, 2 }
  0x82   :  { %v101_v24 = vadd.f32 %v99_v9, %v853_v8  ;;  %v107_v34 = vadd.f32 %v105_v22, %v889_v20  ;;  %v291_v35 = vstv %s972_s24  ;;  %v1039_v16 = vadd.f32 %v426_v2, %v412_v19 }
  0x83   :  { %v1041_v17 = vadd.f32 %v432_v32, %v418_v21  ;;  %v436_v8 = vrot.slane %v986_v44, 1  ;;  %v452_v20 = vrot.slane %v986_v44, 2 }
  0x86   :  { %v1026_v23 = vpop.permute.xlu1 %234  ;;  %v96_v27 = vpop.permute.xlu0 %95 }
  0x87   :  { %v249_v61 = vrot.slane %v1026_v23, 1  ;;  %v100_v45 = vmul.f32 %v98_v28, %v96_v27  ;;  %v106_v0 = vmul.f32 %v104_v38, %v96_v27  ;;  %v110_v3 = vrot.slane %v96_v27, 1 }
  0x88   :  { %v126_v55 = vrot.slane %v96_v27, 2  ;;  %v1048_v28 = vmul.f32 %v285_v60, %v918_v31  ;;  %v1053_v38 = vmul.f32 %v291_v35, %v918_v31  ;;  %v239_v21 = vmul.f32 %v237_v25, %v1026_v23 }
  0x89   :  { %v102_v29 = vadd.f32 %v100_v45, %v86_v51  ;;  %v108_v9 = vadd.f32 %v106_v0, %v92_v53  ;;  %v250_v2 = vsel %vm61_vm0, %v248_v37, %v249_v61  ;;  %v111_v32 = vsel %vm61_vm0, %v109_v33, %v110_v3 }
  0x8a   :  { %v112_v27 = vsel %vm61_vm0, %v110_v3, %v109_v33  ;;  %v115_v19 = vmul.f32 %v114_v54, %v111_v32  ;;  %v121_v25 = vmul.f32 %v120_v42, %v111_v32  ;;  %v245_v53 = vmul.f32 %v243_v26, %v1026_v23 }
  0x8b   :  { %v116_v7 = vmul.f32 %v114_v54, %v112_v27  ;;  %v122_v51 = vmul.f32 %v120_v42, %v112_v27  ;;  %v127_v45 = vsel %vm78_vm1, %v125_v49, %v126_v55  ;;  %v128_v33 = vsel %vm78_vm1, %v126_v55, %v125_v49 }
  0x8c   :  { %v241_v3 = vadd.f32 %v239_v21, %v920_v59  ;;  %v265_v42 = vrot.slane %v1026_v23, 2  ;;  %v251_v26 = vsel %vm61_vm0, %v249_v61, %v248_v37  ;;  %v254_v22 = vmul.f32 %v253_v15, %v250_v2 }
  0x8d   :  { %v118_v32 = vadd.f32 %v116_v7, %v102_v29  ;;  %v124_v27 = vadd.f32 %v122_v51, %v108_v9  ;;  %v117_v49 = vadd.f32 %v115_v19, %v101_v24  ;;  %v123_v55 = vadd.f32 %v121_v25, %v107_v34 }
  0x8e   :  { %v144_v0 = vpop.permute.xlu1 %143  ;;  %v142_v4 = vpop.permute.xlu0 %141  ;;  %v131_v54 = vmul.f32 %v130_v12, %v127_v45  ;;  %v132_v59 = vmul.f32 %v130_v12, %v128_v33  ;;  %v138_v7 = vmul.f32 %v136_v43, %v128_v33  ;;  %v137_v21 = vmul.f32 %v136_v43, %v127_v45 }
  0x8f   :  { %v158_v23 = vrot.slane %v144_v0, 1  ;;  %v148_v29 = vmul.f32 %v146_v46, %v144_v0  ;;  %v154_v37 = vmul.f32 %v152_v48, %v144_v0  ;;  %v157_v61 = vrot.slane %v142_v4, 1 }
  0x90   :  { %v134_v9 = vadd.f32 %v132_v59, %v118_v32  ;;  %v140_v24 = vadd.f32 %v138_v7, %v124_v27  ;;  %v133_v34 = vadd.f32 %v131_v54, %v117_v49  ;;  %v147_v19 = vmul.f32 %v146_v46, %v142_v4 }
  0x91   :  { %v247_v25 = vadd.f32 %v245_v53, %v922_v11  ;;  %v255_v12 = vmul.f32 %v253_v15, %v251_v26  ;;  %v139_v51 = vadd.f32 %v137_v21, %v123_v55  ;;  %v153_v33 = vmul.f32 %v152_v48, %v142_v4 }
  0x92   :  { %v260_v43 = vmul.f32 %v259_v52, %v250_v2  ;;  %v261_v45 = vmul.f32 %v259_v52, %v251_v26  ;;  %v159_v54 = vsel %vm61_vm0, %v157_v61, %v158_v23  ;;  %v160_v11 = vsel %vm61_vm0, %v158_v23, %v157_v61 }
  0x93   :  { %v266_v15 = vsel %vm78_vm1, %v264_v62, %v265_v42  ;;  %v267_v46 = vsel %vm78_vm1, %v265_v42, %v264_v62  ;;  %v174_v52 = vrot.slane %v144_v0, 2  ;;  %v173_v48 = vrot.slane %v142_v4, 2 }
  0x94   :  { %v150_v53 = vadd.f32 %v148_v29, %v134_v9  ;;  %v156_v32 = vadd.f32 %v154_v37, %v140_v24  ;;  %v149_v27 = vadd.f32 %v147_v19, %v133_v34  ;;  %v256_v26 = vadd.f32 %v254_v22, %v1019_v40 }
  0x95   :  { %v155_v49 = vadd.f32 %v153_v33, %v139_v51  ;;  %v163_v55 = vmul.f32 %v162_v18, %v159_v54  ;;  %v164_v59 = vmul.f32 %v162_v18, %v160_v11  ;;  %v169_v7 = vmul.f32 %v168_v50, %v159_v54 }
  0x96   :  { %v420_v2 = vpop.permute.xlu1 %419  ;;  %v257_v4 = vadd.f32 %v255_v12, %v241_v3  ;;  %v170_v42 = vmul.f32 %v168_v50, %v160_v11  ;;  %v175_v40 = vsel %vm78_vm1, %v173_v48, %v174_v52  ;;  %v176_v18 = vsel %vm78_vm1, %v174_v52, %v173_v48  ;;  %v283_v51 = vpop.permute.xlu0 %282 }
  0x97   :  { %v425_v63 = vmul.f32 %v424_v57, %v420_v2  ;;  %v431_v62 = vmul.f32 %v430_v14, %v420_v2  ;;  %v435_v0 = vrot.slane %v420_v2, 1  ;;  %v262_v22 = vadd.f32 %v260_v43, %v1022_v41 }
  0x98   :  { %v451_v50 = vrot.slane %v420_v2, 2  ;;  %v263_v3 = vadd.f32 %v261_v45, %v247_v25  ;;  %v165_v23 = vadd.f32 %v163_v55, %v149_v27  ;;  %v166_v21 = vadd.f32 %v164_v59, %v150_v53 }
  0x99   :  { %v437_v57 = vsel %vm61_vm0, %v435_v0, %v436_v8  ;;  %v438_v14 = vsel %vm61_vm0, %v436_v8, %v435_v0  ;;  %v171_v29 = vadd.f32 %v169_v7, %v155_v49  ;;  %v427_v41 = vadd.f32 %v425_v63, %v988_v47 }
  0x9a   :  { %v433_v37 = vadd.f32 %v431_v62, %v999_v56  ;;  %v441_v61 = vmul.f32 %v440_v10, %v437_v57  ;;  %v442_v9 = vmul.f32 %v440_v10, %v438_v14  ;;  %v447_v24 = vmul.f32 %v446_v30, %v437_v57 }
  0x9b   :  { %v172_v8 = vadd.f32 %v170_v42, %v156_v32  ;;  %v179_v34 = vmul.f32 %v178_v58, %v175_v40  ;;  %v448_v19 = vmul.f32 %v446_v30, %v438_v14  ;;  %v270_v25 = vmul.f32 %v269_v5, %v266_v15 }
  0x9c   :  { %v180_v12 = vmul.f32 %v178_v58, %v176_v18  ;;  %v185_v47 = vmul.f32 %v184_v6, %v175_v40  ;;  %v186_v56 = vmul.f32 %v184_v6, %v176_v18  ;;  %v453_v10 = vsel %vm78_vm1, %v451_v50, %v452_v20 }
  0x9d   :  { %v454_v30 = vsel %vm78_vm1, %v452_v20, %v451_v50  ;;  %v271_v58 = vmul.f32 %v269_v5, %v267_v46  ;;  %v272_v33 = vadd.f32 %v270_v25, %v256_v26  ;;  %v276_v43 = vmul.f32 %v275_v36, %v266_v15 }
  0x9e   :  { %v443_v45 = vadd.f32 %v441_v61, %v427_v41  ;;  %v444_v6 = vadd.f32 %v442_v9, %v1039_v16  ;;  %v449_v54 = vadd.f32 %v447_v24, %v433_v37  ;;  %v277_v11 = vmul.f32 %v275_v36, %v267_v46 }
  0x9f   :  { %v450_v52 = vadd.f32 %v448_v19, %v1041_v17  ;;  %v273_v48 = vadd.f32 %v271_v58, %v257_v4  ;;  %v278_v44 = vadd.f32 %v276_v43, %v262_v22  ;;  %v287_v20 = vmul.f32 %v285_v60, %v283_v51 }
  0xa0   :  { %v279_v5 = vadd.f32 %v277_v11, %v263_v3  ;;  %v293_v15 = vmul.f32 %v291_v35, %v283_v51  ;;  %v297_v2 = vrot.slane %v283_v51, 1  ;;  %v313_v16 = vrot.slane %v283_v51, 2 }
  0xa1   :  { %v457_v36 = vmul.f32 %v456_v1, %v453_v10  ;;  %v288_v17 = vadd.f32 %v1048_v28, %v272_v33  ;;  %v294_v46 = vadd.f32 %v1053_v38, %v278_v44  ;;  %v289_v53 = vadd.f32 %v287_v20, %v273_v48 }
  0xa2   :  { %v295_v32 = vadd.f32 %v293_v15, %v279_v5  ;;  %v298_v60 = vsel %vm61_vm0, %v296_v39, %v297_v2  ;;  %v299_v35 = vsel %vm61_vm0, %v297_v2, %v296_v39  ;;  %v1248_v27 = vrot.slane %v918_v31, 2 }
  0xa3   :  { %v1249_v38 = vstv %s991_s25  ;;  %v1251_v59 = vstv %s1002_s27  ;;  %v1253_v0 = vstv %s948_s12  ;;  %v1255_v40 = vstv %s1008_s30 }
  0xa4   :  { %v314_v28 = vsel %vm78_vm1, %v1248_v27, %v313_v16  ;;  %v302_v26 = vmul.f32 %v1249_v38, %v298_v60  ;;  %v1250_v49 = vmov %v1249_v38  ;;  %v308_v7 = vmul.f32 %v1251_v59, %v298_v60 }
  0xa5   :  { %v303_v55 = vmul.f32 %v1250_v49, %v299_v35  ;;  %v1252_v63 = vmov %v1251_v59  ;;  %v463_v4 = vmul.f32 %v1253_v0, %v453_v10  ;;  %v1254_v42 = vmov %v1248_v27 }
  0xa6   :  { %v309_v62 = vmul.f32 %v1252_v63, %v299_v35  ;;  %v315_v39 = vsel %vm78_vm1, %v313_v16, %v1254_v42  ;;  %v318_v18 = vmul.f32 %v1255_v40, %v314_v28  ;;  %v1256_v22 = vstv %s1028_s4 }
  0xa7   :  { %v324_v57 = vmul.f32 %v1256_v22, %v314_v28  ;;  %v304_v14 = vadd.f32 %v302_v26, %v288_v17  ;;  %v305_v50 = vadd.f32 %v303_v55, %v289_v53  ;;  %v310_v3 = vadd.f32 %v308_v7, %v294_v46 }
  0xa8   :  { %v311_v41 = vadd.f32 %v309_v62, %v295_v32  ;;  %v458_v37 = vmul.f32 %v456_v1, %v454_v30  ;;  %v1257_v61 = vmov %v1253_v0  ;;  %v1258_v24 = vmov %v1255_v40 }
  0xa9   :  { %v464_v9 = vmul.f32 %v1257_v61, %v454_v30  ;;  %v319_v19 = vmul.f32 %v1258_v24, %v315_v39  ;;  %v1259_v25 = vmov %v1256_v22  ;;  %v181_v31 = vadd.f32 %v179_v34, %v165_v23 }
  0xaa   :  { %v325_v10 = vmul.f32 %v1259_v25, %v315_v39  ;;  %v187_v51 = vadd.f32 %v185_v47, %v171_v29  ;;  %v320_v13 = vadd.f32 %v318_v18, %v304_v14  ;;  %v326_v58 = vadd.f32 %v324_v57, %v310_v3 }
  0xab   :  { %v182_v33 = vadd.f32 %v180_v12, %v166_v21  ;;  %v188_v43 = vadd.f32 %v186_v56, %v172_v8  ;;  %v321_v11 = vadd.f32 %v319_v19, %v305_v50  ;;  %v459_v44 = vadd.f32 %v457_v36, %v443_v45 }
  0xac   :  { %v327_v48 = vadd.f32 %v325_v10, %v311_v41  ;;  %v465_v20 = vadd.f32 %v463_v4, %v449_v54  ;;  %v467_v5 = vadd.f32 %v320_v13, %v181_v31  ;;  %v473_v15 = vadd.f32 %v326_v58, %v187_v51 }
  0xad   :  { %v460_v2 = vadd.f32 %v458_v37, %v444_v6  ;;  %v466_v1 = vadd.f32 %v464_v9, %v450_v52  ;;  %v468_v16 = vadd.f32 %v321_v11, %v182_v33 }
  0xae   :  { %v474_v30 = vadd.f32 %v327_v48, %v188_v43  ;;  %v469_v17 = vadd.f32 %v467_v5, %v459_v44  ;;  %v475_v46 = vadd.f32 %v473_v15, %v465_v20 }
  0xaf   :  { %v470_v53 = vadd.f32 %v468_v16, %v460_v2 }
  0xb0   :  { %v476_v32 = vadd.f32 %v474_v30, %v466_v1  ;;  %471 = vst [vmem:[%s1247_s3] sm:$0xff] %v469_v17 }
  0xb1   :  { %472 = vst [vmem:[%s1247_s3 + $0x8] sm:$0xff] %v470_v53 }
  0xb2   :  { %544 = vst [vmem:[%s1247_s3 + $0x10] sm:$0xff] %v475_v46 }
  0xb3   :  { %545 = vst [vmem:[%s1247_s3 + $0x18] sm:$0xff] %v476_v32 }
  0xb4   :  { %484 = vsyncpa [#allocation3], 1 }
  0xb5   :  { %485 = vsyncpa [#allocation5], 1 }

</bundles_post_ra>
